<compile_context>
chip_gen: v5e
topology: v5e:2x2
jax: 0.10.0
libtpu: 0.0.40
codegen_flags: <defaults>
</compile_context>

<pallas_src>
import jax
import jax.numpy as jnp
from jax.experimental import pallas as pl
from jax.experimental.pallas import tpu as pltpu

_LANES = 128            # vreg lane width: trailing dim 128 => unmasked full-width vst
_MAX_BLOCK_ROWS = 8192  # 8192 x 128 f32 = 4 MiB per block; multiple of 32 sublanes


def _copy_kernel(x_ref, o_ref):
    # x_ref / o_ref: (block_rows, 128) lane-dense VMEM tiles.
    o_ref[...] = x_ref[...]


def modelbase_forward(x: jax.Array, lead_times: jax.Array | None = None) -> jax.Array:
    """Pallas equivalent of ModelBase.forward(x, lead_times).

    x:          (N, C, H, W) array (NCHW, matching PyTorch conv input).
    lead_times: (N,) int32 — unused by the abstract forward; accepted only so
                the call signature matches the PyTorch module.
    Returns x unchanged (the base class defines no computation).
    """
    del lead_times  # unused by the abstract base class
    orig_shape = x.shape
    total = x.size
    if total == 0:
        return x

    itemsize = jnp.dtype(x.dtype).itemsize

    # Lane-dense 2D view of the flattened array; pad only if total % 128 != 0.
    rows = pl.cdiv(total, _LANES)
    pad = rows * _LANES - total
    xf = x.reshape(-1)
    if pad:
        xf = jnp.pad(xf, (0, pad))
    x2 = xf.reshape(rows, _LANES)

    if rows <= _MAX_BLOCK_ROWS:
        # Full-extent block: exempt from the (8,128) divisibility rule and the
        # packed-dtype minimum tile; at most 4 MiB (f32), fits VMEM everywhere.
        block_rows = rows
        grid = (1,)
    else:
        # Tiled + software-pipelined; 8192 is a multiple of 32 sublanes, so the
        # block layout is dense for f32/bf16/int8.  Ragged last block is handled
        # by Pallas (out-of-bounds output lanes are simply not written back).
        block_rows = _MAX_BLOCK_ROWS
        grid = (pl.cdiv(rows, block_rows),)

    block_bytes = block_rows * _LANES * itemsize
    # 2 operands x 2 pipeline buffers + headroom; never below 8 MiB, max ~17 MiB
    # for f32 — comfortably under v7x's 64 MiB per-core VMEM.
    vmem_limit = max(4 * block_bytes + (1 << 20), 8 * 1024 * 1024)

    out2 = pl.pallas_call(
        _copy_kernel,
        out_shape=jax.ShapeDtypeStruct((rows, _LANES), x.dtype),
        grid=grid,
        in_specs=[pl.BlockSpec((block_rows, _LANES), lambda i: (i, 0))],
        out_specs=pl.BlockSpec((block_rows, _LANES), lambda i: (i, 0)),
        # Output buffer is the input buffer: XLA elides the second HBM array
        # whenever the operand is donatable (P8 in the Pallas playbook).
        input_output_aliases={0: 0},
        cost_estimate=pl.CostEstimate(
            flops=0,
            transcendentals=0,
            bytes_accessed=2 * total * itemsize,
        ),
        compiler_params=pltpu.CompilerParams(
            dimension_semantics=("parallel",),
            vmem_limit_bytes=vmem_limit,
        ),
    )(x2)

    out = out2.reshape(-1)
    if pad:
        out = out[:total]
    return out.reshape(orig_shape)


if __name__ == "__main__":
    key = jax.random.PRNGKey(0)
    kx, kt = jax.random.split(key)

    # Small NCHW input consistent with a conv-net style model.
    x = jax.random.normal(kx, (2, 4, 16, 16), dtype=jnp.float32)
    lead_times = jax.random.randint(kt, (2,), 0, 10, dtype=jnp.int32)

    out = modelbase_forward(x, lead_times)
    jax.block_until_ready(out)

    # Base-class forward defines no transformation; verify identity semantics.
    assert out.shape == x.shape and out.dtype == x.dtype
    assert bool(jnp.allclose(out, x))

    print("KERNEL_OK")
</pallas_src>

<mosaic_0001>
module attributes {stable_mosaic.version = 11 : i64} {
  func.func @_copy_kernel(%arg0: i32, %arg1: memref<16x128xf32, #tpu.memory_space<vmem>>, %arg2: memref<16x128xf32, #tpu.memory_space<vmem>>) attributes {dimension_semantics = [#tpu.dimension_semantics<parallel>], iteration_bounds = array<i64: 1>, scalar_prefetch = 0 : i64, scratch_operands = 0 : i64, tpu.core_type = #tpu.core_type<tc>, window_params = [{transform_indices = @transform_0, window_bounds = array<i64: 16, 128>}, {transform_indices = @transform_1, window_bounds = array<i64: 16, 128>}]} {
    %c0 = arith.constant 0 : index
    %c0_0 = arith.constant 0 : index
    %0 = vector.load %arg1[%c0, %c0_0] : memref<16x128xf32, #tpu.memory_space<vmem>>, vector<16x128xf32>
    %c0_1 = arith.constant 0 : index
    %c0_2 = arith.constant 0 : index
    %1 = vector.load %arg2[%c0_1, %c0_2] : memref<16x128xf32, #tpu.memory_space<vmem>>, vector<16x128xf32>
    tpu.vector_store %arg2[%c0_1, %c0_2], %0 {strides = array<i32>} : memref<16x128xf32, #tpu.memory_space<vmem>>, vector<16x128xf32>,
    return
  }
  func.func @transform_0(%arg0: i32) -> (i32, i32) {
    %c0_i32 = arith.constant 0 : i32
    %c0_i32_0 = arith.constant 0 : i32
    return %arg0, %c0_i32 : i32, i32
  }
  func.func @transform_1(%arg0: i32) -> (i32, i32) {
    %c0_i32 = arith.constant 0 : i32
    %c0_i32_0 = arith.constant 0 : i32
    return %arg0, %c0_i32 : i32, i32
  }
}

</mosaic_0001>

<bundles_post_ra>
// kernel: tpu_custom_call.1
= control target key start
LH: loop header
LB: loop body
LE: loop exit
PB: predicated region body
PF: predicated region fallthrough
CT: control target
= control target key end

     0   :  { %6 = vsyncpa [#allocation3], 0  ;;  %s124_s0 = inlined_call_operand.hbm [shape: f32[16,128], index: 0, kind: input, shape index: {}, may-alias: {0,1}]   ;;  %s125_s1 = inlined_call_operand.hbm [shape: f32[16,128], index: 1, kind: output, shape index: {}, may-alias: {0,1}]  }
   0x1   :  { %7 = vsyncpa [#allocation4], 0  ;;  %s12_s8 = sshll.u32 %s124_s0, 4  ;;  %s104_s9 = smov [#allocation2]   ;;  %s13_s8 = int_to_ptr.hbm [resolvable:$true] %s12_s8 }
   0x2   :  { %s14_s10 = sshll.u32 %s104_s9, 4  ;;  %s105_s11 = smov 128   ;;  %s15_s10 = int_to_ptr.vmem [resolvable:$true] %s14_s10 }
   0x3   :  { %s106_s12 = smov 8  }
   0x4   :  { %20 = dma.hbm_to_vmem [thread:$0]  %s13_s8, 256, %s15_s10, [#allocation3], %s105_s11, %s105_s11, %s106_s12  }
   0x5   :  { %100 = dma.done.wait [#allocation3], 256  }
   0x6   :  { %101 = vsyncadd [#allocation3], 4294967040  ;;  %s107_s13 = smov [#allocation5]   ;;  %s35_s17 = sshll.u32 %s125_s1, 4  ;;  %v25_v0 = vld [vmem:[#allocation2] sm:$0xff]  ;;  %v26_v1 = vld [vmem:[#allocation2 + $0x8] sm:$0xff]  ;;  %s36_s17 = int_to_ptr.hbm [resolvable:$true] %s35_s17 }
   0x7   :  { %s33_s14 = sshll.u32 %s107_s13, 4  ;;  %27 = vst [vmem:[#allocation5] sm:$0xff] %v25_v0  ;;  %s34_s14 = int_to_ptr.vmem [resolvable:$true] %s33_s14 }
   0x8   :  { %28 = vst [vmem:[#allocation5 + $0x8] sm:$0xff] %v26_v1 }
   0x9   :  { %41 = dma.vmem_to_hbm [thread:$0]  %s34_s14, 256, %s36_s17, [#allocation4], %s105_s11, %s105_s11, %s106_s12  }
   0xa   :  { %102 = dma.done.wait [#allocation4], 256  }
   0xb   :  { %103 = vsyncadd [#allocation4], 4294967040 }
   0xc   :  { %46 = vsyncpa [#allocation3], 1 }
   0xd   :  { %47 = vsyncpa [#allocation4], 1 }

</bundles_post_ra>
